<compile_context>
chip_gen: v7x
topology: tpu7x:2x2x1
jax: 0.10.0
libtpu: 0.0.40
codegen_flags: <defaults>
</compile_context>

<pallas_src>
import functools
import math

import jax
import jax.numpy as jnp
from jax import lax
from jax.experimental import pallas as pl
from jax.experimental.pallas import tpu as pltpu


# --------------------------------------------------------------------------- #
# Tiling helpers
# --------------------------------------------------------------------------- #
def _round_up(x, m):
    return ((x + m - 1) // m) * m


def _device_budgets():
    """(per-buffer x-tile byte budget, vmem_limit cap) per TPU generation."""
    try:
        kind = jax.devices()[0].device_kind.lower()
    except Exception:
        kind = ""
    if "v5" in kind or "v6" in kind:
        # 128 MiB VMEM parts: bigger streamed tiles, higher scoped limit.
        return 12 * 1024 * 1024, 96 * 1024 * 1024
    # v7x (64 MiB VMEM per TC) or unknown: conservative.
    return 5 * 1024 * 1024, 48 * 1024 * 1024


def _pick_time_tile(S, row_bytes, budget):
    """Largest t with t % 8 == 0, S % t == 0, t*row_bytes <= budget; else S."""
    cap = min(S, max(8, budget // max(row_bytes, 1)))
    t = (cap // 8) * 8
    while t >= 8:
        if S % t == 0:
            return t
        t -= 8
    return S


def _pick_folded_batch_tile(B, Din):
    """TB dividing B with (TB*Din) % 128 == 0 (prefer >=2 tiles); else full B."""
    q = 128 // math.gcd(Din, 128)
    cands = [d for d in range(q, B + 1, q) if B % d == 0]
    if not cands:
        return B
    target = max(q, 2048 // max(Din, 1))
    pref = [d for d in cands if d <= target and B // d >= 2]
    if pref:
        return max(pref)
    ok = [d for d in cands if d <= target]
    return max(ok) if ok else min(cands)


def _pick_aligned_batch_tile(B, target=64):
    """TB dividing B with TB % 8 == 0 (prefer >=2 tiles); else full B."""
    cands = [d for d in range(8, B + 1, 8) if B % d == 0]
    if not cands:
        return B
    pref = [d for d in cands if d <= target and B // d >= 2]
    if pref:
        return max(pref)
    ok = [d for d in cands if d <= target]
    return max(ok) if ok else min(cands)


# --------------------------------------------------------------------------- #
# Pooling kernel: time-major input, batch folded into the lane axis
# --------------------------------------------------------------------------- #
def _pool_time_major_kernel(TS, tmin_ref, tlast_ref, x_ref, len_ref, o_ref):
    """x_ref:   (TS, TB*Din) streamed block (native dtype), lane-dense
       len_ref: (1, TB*Din) int32 per-lane valid length (length repeated Din x)
       o_ref:   (1, TB*Din) f32 pooled output, resident across time blocks
       tmin/tlast (SMEM): per-batch-tile min length / last needed time block
    """
    b = pl.program_id(0)
    s = pl.program_id(1)
    ns = pl.num_programs(1)

    @pl.when(s == 0)
    def _():
        o_ref[...] = jnp.zeros_like(o_ref)

    # Skip compute entirely on fully-padded time blocks (their DMA is also
    # skipped because the x index_map clamps to tlast[b]).
    @pl.when(s <= tlast_ref[b])
    def _():
        x = x_ref[...].astype(jnp.float32)                   # (TS, TB*Din)
        fully_valid = (s + 1) * TS <= tmin_ref[b]

        @pl.when(fully_valid)
        def _():
            o_ref[...] += jnp.sum(x, axis=0, keepdims=True)

        @pl.when(jnp.logical_not(fully_valid))
        def _():
            t_idx = s * TS + lax.broadcasted_iota(jnp.int32, (TS, 1), 0)
            valid = t_idx < len_ref[...]                     # (TS, TB*Din)
            xm = jnp.where(valid, x, 0.0)
            o_ref[...] += jnp.sum(xm, axis=0, keepdims=True)

    @pl.when(s == ns - 1)
    def _():
        lens_f = jnp.maximum(len_ref[...].astype(jnp.float32), 1.0)
        o_ref[...] = o_ref[...] * pl.reciprocal(lens_f, approx=False)


def _masked_mean_time_major(x, lengths, batch_tile=None, time_tile=None):
    """x: (S, B, Din) native dtype, lengths: (B,) int -> pooled (B, Din) f32."""
    S, B, Din = x.shape
    itemsize = jnp.dtype(x.dtype).itemsize
    x_budget, vmem_cap = _device_budgets()

    if batch_tile is not None:
        TB = batch_tile
        assert B % TB == 0 and (TB == B or (TB * Din) % 128 == 0), \
            "batch_tile must divide B and keep the folded lane width 128-aligned"
    else:
        TB = _pick_folded_batch_tile(B, Din)
    TBD = TB * Din
    TBD_pad = _round_up(TBD, 128)

    if time_tile is not None:
        TS = time_tile
        assert S % TS == 0 and (TS == S or TS % 8 == 0), \
            "time_tile must divide S and be a multiple of 8 (or the full S)"
    else:
        TS = _pick_time_tile(S, TBD_pad * itemsize, x_budget)
    nb, ns = B // TB, S // TS

    # Free (contiguous) reshape: lane axis becomes b*Din + d -> lane-dense.
    x2 = x.reshape(S, B * Din)
    lens_i = lengths.astype(jnp.int32)
    lens_lane = jnp.repeat(lens_i, Din).reshape(1, B * Din)

    # Per-batch-tile length stats for the fast path / DMA+compute skip.
    lt = lens_i.reshape(nb, TB)
    tile_min = jnp.min(lt, axis=1).astype(jnp.int32)
    tile_last = jnp.maximum((jnp.max(lt, axis=1) + TS - 1) // TS - 1, 0
                            ).astype(jnp.int32)

    # Padded-footprint VMEM budget (last two block dims rounded to (8,128)).
    ts_pad = _round_up(TS, 8)
    x_blk = ts_pad * TBD_pad * itemsize
    aux_blk = 8 * TBD_pad * 4                     # lens (int32) / out (f32) rows
    need = 2 * x_blk + 4 * aux_blk + (2 << 20)
    vmem_limit = int(min(max(need, 16 << 20), vmem_cap))

    kernel = functools.partial(_pool_time_major_kernel, TS)
    pooled_f = pl.pallas_call(
        kernel,
        out_shape=jax.ShapeDtypeStruct((1, B * Din), jnp.float32),
        grid_spec=pltpu.PrefetchScalarGridSpec(
            num_scalar_prefetch=2,
            grid=(nb, ns),
            in_specs=[
                # Clamp the time block index: fully-padded blocks repeat the
                # previous index -> Pallas skips the HBM re-DMA.
                pl.BlockSpec((TS, TBD),
                             lambda b, s, tmin, tlast:
                             (jnp.minimum(s, tlast[b]), b)),
                pl.BlockSpec((1, TBD), lambda b, s, tmin, tlast: (0, b)),
            ],
            out_specs=pl.BlockSpec((1, TBD), lambda b, s, tmin, tlast: (0, b)),
        ),
        compiler_params=pltpu.CompilerParams(
            dimension_semantics=("parallel", "arbitrary"),
            vmem_limit_bytes=vmem_limit,
        ),
    )(tile_min, tile_last, x2, lens_lane)
    # Free wrapper reshape (contiguous split of the last dim).
    return pooled_f.reshape(B, Din)


# --------------------------------------------------------------------------- #
# Pooling kernel: batch-first input, k time steps packed into the lane axis
# --------------------------------------------------------------------------- #
def _pool_batch_first_kernel(Din, k, TSp,
                             tmin_ref, tlast_ref,
                             x_ref, len_ref, joff_ref,
                             o_ref, acc_ref):
    """x_ref:   (TB, TSp, k*Din) streamed block (native dtype)
       len_ref: (TB, 1) int32 valid lengths for this batch tile
       joff_ref:(1, 1, k*Din) int32 lane -> packed time offset (lane // Din)
       o_ref:   (TB, Din) f32 pooled output (written at the last time block)
       acc_ref: (TB, k*Din) f32 accumulator scratch (persists across blocks)
    """
    b = pl.program_id(0)
    s = pl.program_id(1)
    ns = pl.num_programs(1)

    @pl.when(s == 0)
    def _():
        acc_ref[...] = jnp.zeros_like(acc_ref)

    steps = TSp * k  # real time steps covered by one block

    @pl.when(s <= tlast_ref[b])
    def _():
        x = x_ref[...].astype(jnp.float32)                   # (TB, TSp, k*Din)
        fully_valid = (s + 1) * steps <= tmin_ref[b]

        @pl.when(fully_valid)
        def _():
            acc_ref[...] += jnp.sum(x, axis=1)

        @pl.when(jnp.logical_not(fully_valid))
        def _():
            TB = x.shape[0]
            p_idx = lax.broadcasted_iota(jnp.int32, (1, TSp, 1), 1)
            t_idx = (s * TSp + p_idx) * k + joff_ref[...]    # (1, TSp, k*Din)
            valid = t_idx < len_ref[...].reshape(TB, 1, 1)   # (TB, TSp, k*Din)
            xm = jnp.where(valid, x, 0.0)
            acc_ref[...] += jnp.sum(xm, axis=1)

    @pl.when(s == ns - 1)
    def _():
        acc = acc_ref[...]                                   # (TB, k*Din)
        pooled = acc[:, :Din]
        for j in range(1, k):                                # collapse k lane groups
            pooled = pooled + acc[:, j * Din:(j + 1) * Din]
        lens_f = jnp.maximum(len_ref[...].astype(jnp.float32), 1.0)  # (TB, 1)
        o_ref[...] = pooled * pl.reciprocal(lens_f, approx=False)


def _masked_mean_batch_first(x, lengths, batch_tile=None, time_tile=None):
    """x: (B, S, Din) native dtype, lengths: (B,) int -> pooled (B, Din) f32."""
    B, S, Din = x.shape
    itemsize = jnp.dtype(x.dtype).itemsize
    x_budget, vmem_cap = _device_budgets()

    # Pack k time steps into lanes (free contiguous reshape).
    k = 1
    for cand in range(min(max(128 // max(Din, 1), 1), S), 0, -1):
        if S % cand == 0:
            k = cand
            break
    Sp = S // k
    kD = k * Din
    x3 = x.reshape(B, Sp, kD)

    if batch_tile is not None:
        TB = batch_tile
        assert B % TB == 0 and (TB == B or TB % 8 == 0), \
            "batch_tile must divide B and be a multiple of 8 (or the full B)"
    else:
        TB = _pick_aligned_batch_tile(B)

    kD_pad = _round_up(kD, 128)
    if time_tile is not None:
        TSp = time_tile
        assert Sp % TSp == 0 and (TSp == Sp or TSp % 8 == 0), \
            "time_tile (packed steps) must divide S//k and be a multiple of 8"
    else:
        TSp = _pick_time_tile(Sp, TB * kD_pad * itemsize, x_budget)
    nb, ns = B // TB, Sp // TSp

    lens_i = lengths.astype(jnp.int32)
    lens2 = lens_i.reshape(B, 1)
    joff = jnp.repeat(jnp.arange(k, dtype=jnp.int32), Din).reshape(1, 1, kD)

    lt = lens_i.reshape(nb, TB)
    tile_min = jnp.min(lt, axis=1).astype(jnp.int32)
    steps = TSp * k
    tile_last = jnp.maximum((jnp.max(lt, axis=1) + steps - 1) // steps - 1, 0
                            ).astype(jnp.int32)

    # Padded-footprint VMEM budget.
    tb_pad = _round_up(TB, 8)
    tsp_pad = _round_up(TSp, 8)
    x_blk = TB * tsp_pad * kD_pad * itemsize
    out_blk = tb_pad * _round_up(Din, 128) * 4
    acc_blk = tb_pad * kD_pad * 4
    lens_blk = tb_pad * 128 * 4
    joff_blk = 8 * kD_pad * 4
    need = 2 * x_blk + 2 * out_blk + acc_blk + 2 * lens_blk + 2 * joff_blk + (2 << 20)
    vmem_limit = int(min(max(need, 16 << 20), vmem_cap))

    kernel = functools.partial(_pool_batch_first_kernel, Din, k, TSp)
    pooled = pl.pallas_call(
        kernel,
        out_shape=jax.ShapeDtypeStruct((B, Din), jnp.float32),
        grid_spec=pltpu.PrefetchScalarGridSpec(
            num_scalar_prefetch=2,
            grid=(nb, ns),
            in_specs=[
                pl.BlockSpec((TB, TSp, kD),
                             lambda b, s, tmin, tlast:
                             (b, jnp.minimum(s, tlast[b]), 0)),
                pl.BlockSpec((TB, 1), lambda b, s, tmin, tlast: (b, 0)),
                pl.BlockSpec((1, 1, kD), lambda b, s, tmin, tlast: (0, 0, 0)),
            ],
            out_specs=pl.BlockSpec((TB, Din), lambda b, s, tmin, tlast: (b, 0)),
            scratch_shapes=[pltpu.VMEM((TB, kD), jnp.float32)],
        ),
        compiler_params=pltpu.CompilerParams(
            dimension_semantics=("parallel", "arbitrary"),
            vmem_limit_bytes=vmem_limit,
        ),
    )(tile_min, tile_last, x3, lens2, joff)
    return pooled


# --------------------------------------------------------------------------- #
# Tiny projection kernel: pooled (B, Din) @ W (Din, Dout) + bias
# --------------------------------------------------------------------------- #
def _proj_kernel(p_ref, w_ref, b_ref, o_ref):
    o_ref[...] = (
        jnp.dot(p_ref[...], w_ref[...], preferred_element_type=jnp.float32)
        + b_ref[...]
    ).astype(o_ref.dtype)


def _linear(pooled, weight, bias):
    B, Din = pooled.shape
    Din_w, Dout = weight.shape
    assert Din_w == Din, "weight input dim must match pooled feature dim"
    TB = _pick_aligned_batch_tile(B, target=256)
    nb = B // TB
    w = weight.astype(jnp.float32)
    b2 = bias.astype(jnp.float32).reshape(1, Dout)
    return pl.pallas_call(
        _proj_kernel,
        out_shape=jax.ShapeDtypeStruct((B, Dout), jnp.float32),
        grid_spec=pltpu.PrefetchScalarGridSpec(
            num_scalar_prefetch=0,
            grid=(nb,),
            in_specs=[
                pl.BlockSpec((TB, Din), lambda i: (i, 0)),
                pl.BlockSpec((Din, Dout), lambda i: (0, 0)),
                pl.BlockSpec((1, Dout), lambda i: (0, 0)),
            ],
            out_specs=pl.BlockSpec((TB, Dout), lambda i: (i, 0)),
        ),
        compiler_params=pltpu.CompilerParams(
            dimension_semantics=("parallel",),
        ),
    )(pooled, w, b2)


# --------------------------------------------------------------------------- #
# Public forward
# --------------------------------------------------------------------------- #
@functools.partial(jax.jit, static_argnames=("batch_first", "batch_tile", "time_tile"))
def model_forward(x, lengths, weight, bias, *, batch_first=False,
                  batch_tile=None, time_tile=None):
    """Forward pass of the (minimal concrete) Model.

    x:       (S, B, Din) if batch_first=False else (B, S, Din), native dtype
    lengths: (B,) integer valid lengths
    weight:  (Din, Dout) float32
    bias:    (Dout,)     float32
    returns: (B, Dout)   float32
    """
    if batch_first:
        pooled = _masked_mean_batch_first(x, lengths,
                                          batch_tile=batch_tile,
                                          time_tile=time_tile)
    else:
        pooled = _masked_mean_time_major(x, lengths,
                                         batch_tile=batch_tile,
                                         time_tile=time_tile)
    return _linear(pooled, weight, bias)


def init_params(key, input_size, output_size):
    """Deterministic synthetic parameter init (config.model.input_size ->
    <ModelName>.output_size)."""
    kw, kb = jax.random.split(key)
    scale = 1.0 / jnp.sqrt(jnp.float32(input_size))
    weight = jax.random.normal(kw, (input_size, output_size), jnp.float32) * scale
    bias = jax.random.normal(kb, (output_size,), jnp.float32) * 0.01
    return weight, bias


if __name__ == "__main__":
    SEQ = 8            # time steps
    BATCH = 2
    INPUT_SIZE = 32    # config.model.input_size
    OUTPUT_SIZE = 16   # config.<Model>.output_size

    key = jax.random.PRNGKey(0)
    kx, kp, kx2 = jax.random.split(key, 3)

    weight, bias = init_params(kp, INPUT_SIZE, OUTPUT_SIZE)

    def reference(x_tm, lengths):
        S = x_tm.shape[0]
        mask = (jnp.arange(S)[:, None] < lengths[None, :]).astype(jnp.float32)
        pooled = jnp.sum(x_tm * mask[..., None], axis=0) / jnp.maximum(
            lengths.astype(jnp.float32), 1.0)[:, None]
        return pooled @ weight + bias[None, :]

    # ---- small case (shapes implied by the module interface) ---------------
    x = jax.random.normal(kx, (SEQ, BATCH, INPUT_SIZE), jnp.float32)
    lengths = jnp.array([8, 5], dtype=jnp.int32)
    ref = reference(x, lengths)

    out = jax.block_until_ready(
        model_forward(x, lengths, weight, bias, batch_first=False))
    assert out.shape == (BATCH, OUTPUT_SIZE)
    assert jnp.allclose(out, ref, atol=1e-4, rtol=1e-4)

    x_bf = jnp.transpose(x, (1, 0, 2))   # test-only construction of batch-first input
    out_bf = jax.block_until_ready(
        model_forward(x_bf, lengths, weight, bias, batch_first=True))
    assert out_bf.shape == (BATCH, OUTPUT_SIZE)
    assert jnp.allclose(out_bf, ref, atol=1e-4, rtol=1e-4)

    # ---- multi-tile case: exercises batch/time tiling, the unmasked fast
    #      path and the padded-tile DMA/compute skip --------------------------
    S2, B2 = 64, 8
    x2 = jax.random.normal(kx2, (S2, B2, INPUT_SIZE), jnp.float32)
    lengths2 = jnp.array([64, 64, 33, 40, 5, 2, 7, 1], dtype=jnp.int32)
    ref2 = reference(x2, lengths2)

    out2 = jax.block_until_ready(
        model_forward(x2, lengths2, weight, bias, batch_first=False,
                      batch_tile=4, time_tile=8))
    assert out2.shape == (B2, OUTPUT_SIZE)
    assert jnp.allclose(out2, ref2, atol=1e-4, rtol=1e-4)

    out2_bf = jax.block_until_ready(
        model_forward(jnp.transpose(x2, (1, 0, 2)), lengths2, weight, bias,
                      batch_first=True, time_tile=8))
    assert out2_bf.shape == (B2, OUTPUT_SIZE)
    assert jnp.allclose(out2_bf, ref2, atol=1e-4, rtol=1e-4)

    print("KERNEL_OK")
</pallas_src>

<mosaic_0001>
module attributes {stable_mosaic.version = 11 : i64} {
  func.func @_pool_time_major_kernel(%arg0: i32, %arg1: i32, %arg2: memref<1xi32, #tpu.memory_space<smem>>, %arg3: memref<1xi32, #tpu.memory_space<smem>>, %arg4: memref<8x64xf32, #tpu.memory_space<vmem>>, %arg5: memref<1x64xi32, #tpu.memory_space<vmem>>, %arg6: memref<1x64xf32, #tpu.memory_space<vmem>>) attributes {dimension_semantics = [#tpu.dimension_semantics<parallel>, #tpu.dimension_semantics<arbitrary>], iteration_bounds = array<i64: 1, 1>, scalar_prefetch = 2 : i64, scratch_operands = 0 : i64, tpu.core_type = #tpu.core_type<tc>, window_params = [{transform_indices = @transform_0, window_bounds = array<i64: 8, 64>}, {transform_indices = @transform_1, window_bounds = array<i64: 1, 64>}, {transform_indices = @transform_2, window_bounds = array<i64: 1, 64>}]} {
    %c0_i32 = arith.constant 0 : i32
    %0 = arith.cmpi eq, %arg1, %c0_i32 : i32
    %1 = arith.extui %0 : i1 to i32
    %c0_i32_0 = arith.constant 0 : i32
    %2 = arith.cmpi ne, %1, %c0_i32_0 : i32
    scf.if %2 {
      %cst = arith.constant 0.000000e+00 : f32
      %11 = vector.broadcast %cst : f32 to vector<1x64xf32>
      %c0 = arith.constant 0 : index
      %c0_4 = arith.constant 0 : index
      %12 = vector.load %arg6[%c0, %c0_4] : memref<1x64xf32, #tpu.memory_space<vmem>>, vector<1x64xf32>
      tpu.vector_store %arg6[%c0, %c0_4], %11 {strides = array<i32>} : memref<1x64xf32, #tpu.memory_space<vmem>>, vector<1x64xf32>,
    } else {
    }
    %3 = arith.index_cast %arg0 : i32 to index
    %4 = memref.load %arg3[%3] : memref<1xi32, #tpu.memory_space<smem>>
    %5 = arith.cmpi sle, %arg1, %4 : i32
    %6 = arith.extui %5 : i1 to i32
    %c0_i32_1 = arith.constant 0 : i32
    %7 = arith.cmpi ne, %6, %c0_i32_1 : i32
    scf.if %7 {
      %c0 = arith.constant 0 : index
      %c0_4 = arith.constant 0 : index
      %11 = vector.load %arg4[%c0, %c0_4] : memref<8x64xf32, #tpu.memory_space<vmem>>, vector<8x64xf32>
      %c1_i32 = arith.constant 1 : i32
      %12 = arith.addi %arg1, %c1_i32 : i32
      %c8_i32 = arith.constant 8 : i32
      %13 = arith.muli %12, %c8_i32 : i32
      %14 = arith.index_cast %arg0 : i32 to index
      %15 = memref.load %arg2[%14] : memref<1xi32, #tpu.memory_space<smem>>
      %16 = arith.cmpi sle, %13, %15 : i32
      %17 = arith.extui %16 : i1 to i32
      %c0_i32_5 = arith.constant 0 : i32
      %18 = arith.cmpi ne, %17, %c0_i32_5 : i32
      scf.if %18 {
        %c0_7 = arith.constant 0 : index
        %c0_8 = arith.constant 0 : index
        %22 = vector.load %arg6[%c0_7, %c0_8] : memref<1x64xf32, #tpu.memory_space<vmem>>, vector<1x64xf32>
        %cst = arith.constant dense<0.000000e+00> : vector<64xf32>
        %23 = vector.multi_reduction <add>, %11, %cst [0] : vector<8x64xf32> to vector<64xf32>
        %24 = vector.shape_cast %23 : vector<64xf32> to vector<1x64xf32>
        %25 = arith.addf %22, %24 : vector<1x64xf32>
        %c0_9 = arith.constant 0 : index
        %c0_10 = arith.constant 0 : index
        %26 = vector.load %arg6[%c0_9, %c0_10] : memref<1x64xf32, #tpu.memory_space<vmem>>, vector<1x64xf32>
        tpu.vector_store %arg6[%c0_9, %c0_10], %25 {strides = array<i32>} : memref<1x64xf32, #tpu.memory_space<vmem>>, vector<1x64xf32>,
      } else {
      }
      %true = arith.constant true
      %19 = arith.xori %16, %true : i1
      %20 = arith.extui %19 : i1 to i32
      %c0_i32_6 = arith.constant 0 : i32
      %21 = arith.cmpi ne, %20, %c0_i32_6 : i32
      scf.if %21 {
        %c8_i32_7 = arith.constant 8 : i32
        %22 = arith.muli %arg1, %c8_i32_7 : i32
        %23 = tpu.iota {dimensions = array<i32: 0>} : vector<8x1xi32>
        %24 = vector.broadcast %22 : i32 to vector<8x1xi32>
        %25 = arith.addi %24, %23 : vector<8x1xi32>
        %c0_8 = arith.constant 0 : index
        %c0_9 = arith.constant 0 : index
        %26 = vector.load %arg5[%c0_8, %c0_9] : memref<1x64xi32, #tpu.memory_space<vmem>>, vector<1x64xi32>
        %27 = vector.broadcast %25 : vector<8x1xi32> to vector<8x64xi32>
        %28 = vector.broadcast %26 : vector<1x64xi32> to vector<8x64xi32>
        %29 = arith.cmpi slt, %27, %28 : vector<8x64xi32>
        %cst = arith.constant 0.000000e+00 : f32
        %30 = vector.broadcast %cst : f32 to vector<8x64xf32>
        %31 = arith.select %29, %11, %30 : vector<8x64xi1>, vector<8x64xf32>
        %c0_10 = arith.constant 0 : index
        %c0_11 = arith.constant 0 : index
        %32 = vector.load %arg6[%c0_10, %c0_11] : memref<1x64xf32, #tpu.memory_space<vmem>>, vector<1x64xf32>
        %cst_12 = arith.constant dense<0.000000e+00> : vector<64xf32>
        %33 = vector.multi_reduction <add>, %31, %cst_12 [0] : vector<8x64xf32> to vector<64xf32>
        %34 = vector.shape_cast %33 : vector<64xf32> to vector<1x64xf32>
        %35 = arith.addf %32, %34 : vector<1x64xf32>
        %c0_13 = arith.constant 0 : index
        %c0_14 = arith.constant 0 : index
        %36 = vector.load %arg6[%c0_13, %c0_14] : memref<1x64xf32, #tpu.memory_space<vmem>>, vector<1x64xf32>
        tpu.vector_store %arg6[%c0_13, %c0_14], %35 {strides = array<i32>} : memref<1x64xf32, #tpu.memory_space<vmem>>, vector<1x64xf32>,
      } else {
      }
    } else {
    }
    %c0_i32_2 = arith.constant 0 : i32
    %8 = arith.cmpi eq, %arg1, %c0_i32_2 : i32
    %9 = arith.extui %8 : i1 to i32
    %c0_i32_3 = arith.constant 0 : i32
    %10 = arith.cmpi ne, %9, %c0_i32_3 : i32
    scf.if %10 {
      %c0 = arith.constant 0 : index
      %c0_4 = arith.constant 0 : index
      %11 = vector.load %arg5[%c0, %c0_4] : memref<1x64xi32, #tpu.memory_space<vmem>>, vector<1x64xi32>
      %12 = arith.sitofp %11 : vector<1x64xi32> to vector<1x64xf32>
      %cst = arith.constant 1.000000e+00 : f32
      %13 = vector.broadcast %cst : f32 to vector<1x64xf32>
      %14 = arith.maximumf %12, %13 : vector<1x64xf32>
      %c0_5 = arith.constant 0 : index
      %c0_6 = arith.constant 0 : index
      %15 = vector.load %arg6[%c0_5, %c0_6] : memref<1x64xf32, #tpu.memory_space<vmem>>, vector<1x64xf32>
      %16 = tpu.reciprocal %14 : vector<1x64xf32> -> vector<1x64xf32>
      %17 = arith.mulf %15, %16 : vector<1x64xf32>
      %c0_7 = arith.constant 0 : index
      %c0_8 = arith.constant 0 : index
      %18 = vector.load %arg6[%c0_7, %c0_8] : memref<1x64xf32, #tpu.memory_space<vmem>>, vector<1x64xf32>
      tpu.vector_store %arg6[%c0_7, %c0_8], %17 {strides = array<i32>} : memref<1x64xf32, #tpu.memory_space<vmem>>, vector<1x64xf32>,
    } else {
    }
    return
  }
  func.func @transform_0(%arg0: i32, %arg1: i32, %arg2: memref<1xi32, #tpu.memory_space<smem>>, %arg3: memref<1xi32, #tpu.memory_space<smem>>) -> (i32, i32) {
    %0 = arith.index_cast %arg0 : i32 to index
    %1 = memref.load %arg3[%0] : memref<1xi32, #tpu.memory_space<smem>>
    %2 = arith.minsi %arg1, %1 : i32
    %c0_i32 = arith.constant 0 : i32
    return %2, %arg0 : i32, i32
  }
  func.func @transform_1(%arg0: i32, %arg1: i32, %arg2: memref<1xi32, #tpu.memory_space<smem>>, %arg3: memref<1xi32, #tpu.memory_space<smem>>) -> (i32, i32) {
    %c0_i32 = arith.constant 0 : i32
    %c0_i32_0 = arith.constant 0 : i32
    return %c0_i32, %arg0 : i32, i32
  }
  func.func @transform_2(%arg0: i32, %arg1: i32, %arg2: memref<1xi32, #tpu.memory_space<smem>>, %arg3: memref<1xi32, #tpu.memory_space<smem>>) -> (i32, i32) {
    %c0_i32 = arith.constant 0 : i32
    %c0_i32_0 = arith.constant 0 : i32
    return %c0_i32, %arg0 : i32, i32
  }
}

module attributes {stable_mosaic.version = 11 : i64} {
  func.func @_proj_kernel(%arg0: i32, %arg1: memref<2x32xf32, #tpu.memory_space<vmem>>, %arg2: memref<32x16xf32, #tpu.memory_space<vmem>>, %arg3: memref<1x16xf32, #tpu.memory_space<vmem>>, %arg4: memref<2x16xf32, #tpu.memory_space<vmem>>) attributes {dimension_semantics = [#tpu.dimension_semantics<parallel>], iteration_bounds = array<i64: 1>, scalar_prefetch = 0 : i64, scratch_operands = 0 : i64, tpu.core_type = #tpu.core_type<tc>, window_params = [{transform_indices = @transform_0, window_bounds = array<i64: 2, 32>}, {pipeline_mode = #tpu.pipeline_mode<synchronous>, transform_indices = @transform_1, window_bounds = array<i64: 32, 16>}, {pipeline_mode = #tpu.pipeline_mode<synchronous>, transform_indices = @transform_2, window_bounds = array<i64: 1, 16>}, {transform_indices = @transform_3, window_bounds = array<i64: 2, 16>}]} {
    %c0 = arith.constant 0 : index
    %c0_0 = arith.constant 0 : index
    %0 = vector.load %arg1[%c0, %c0_0] : memref<2x32xf32, #tpu.memory_space<vmem>>, vector<2x32xf32>
    %c0_1 = arith.constant 0 : index
    %c0_2 = arith.constant 0 : index
    %1 = vector.load %arg2[%c0_1, %c0_2] : memref<32x16xf32, #tpu.memory_space<vmem>>, vector<32x16xf32>
    %cst = arith.constant dense<0.000000e+00> : vector<2x16xf32>
    %2 = tpu.matmul %0, %1, %cst {dimension_numbers = #tpu.dot_dimension_numbers<[1], [0], [0], [1], [0, 0, 1, 1], [], []>} : vector<2x32xf32>, vector<32x16xf32>, vector<2x16xf32> -> vector<2x16xf32>
    %c0_3 = arith.constant 0 : index
    %c0_4 = arith.constant 0 : index
    %3 = vector.load %arg3[%c0_3, %c0_4] : memref<1x16xf32, #tpu.memory_space<vmem>>, vector<1x16xf32>
    %4 = vector.broadcast %3 : vector<1x16xf32> to vector<2x16xf32>
    %5 = arith.addf %2, %4 : vector<2x16xf32>
    %c0_5 = arith.constant 0 : index
    %c0_6 = arith.constant 0 : index
    %6 = vector.load %arg4[%c0_5, %c0_6] : memref<2x16xf32, #tpu.memory_space<vmem>>, vector<2x16xf32>
    tpu.vector_store %arg4[%c0_5, %c0_6], %5 {strides = array<i32>} : memref<2x16xf32, #tpu.memory_space<vmem>>, vector<2x16xf32>,
    return
  }
  func.func @transform_0(%arg0: i32) -> (i32, i32) {
    %c0_i32 = arith.constant 0 : i32
    %c0_i32_0 = arith.constant 0 : i32
    return %arg0, %c0_i32 : i32, i32
  }
  func.func @transform_1(%arg0: i32) -> (i32, i32) {
    %c0_i32 = arith.constant 0 : i32
    %c0_i32_0 = arith.constant 0 : i32
    %c0_i32_1 = arith.constant 0 : i32
    return %c0_i32, %c0_i32_0 : i32, i32
  }
  func.func @transform_2(%arg0: i32) -> (i32, i32) {
    %c0_i32 = arith.constant 0 : i32
    %c0_i32_0 = arith.constant 0 : i32
    %c0_i32_1 = arith.constant 0 : i32
    return %c0_i32, %c0_i32_0 : i32, i32
  }
  func.func @transform_3(%arg0: i32) -> (i32, i32) {
    %c0_i32 = arith.constant 0 : i32
    %c0_i32_0 = arith.constant 0 : i32
    return %arg0, %c0_i32 : i32, i32
  }
}

</mosaic_0001>

<bundles_post_ra>
// kernel: model_forward.2
= control target key start
LH: loop header
LB: loop body
LE: loop exit
PB: predicated region body
PF: predicated region fallthrough
CT: control target
= control target key end

     0   :  { %vm46_vm0 = vcmask 516096   ;;  %v137_v0 = vmov 0.0   ;;  %s209_s0 = inlined_call_operand.<no memory space> [shape: s32[1], index: 0, kind: input, shape index: {}]   ;;  %s210_s1 = inlined_call_operand.<no memory space> [shape: s32[1], index: 1, kind: input, shape index: {}]   ;;  %s211_s3 = inlined_call_operand.vmem [shape: s32[1,64], index: 3, kind: input, shape index: {}]   ;;  %s212_s4 = inlined_call_operand.vmem [shape: f32[1,64], index: 4, kind: output, shape index: {}]   ;;  %s213_s2 = inlined_call_operand.vmem [shape: f32[8,64], index: 2, kind: input, shape index: {}]  }
   0x1   :  { %9 = sst [smem:[#allocation3]] %s209_s0  ;;  %p122_p0 = scmp.gt.s32.totalorder %s210_s1, 0  ;;  %47 = vst.msk [vmem:[%s212_s4] sm:$0x1] %vm46_vm0, %v137_v0 }
   0x2   :  { %p124_p1 = scmp.lt.s32.totalorder %s210_s1, 0 }
   0x3   :  { %s215_s1 = smov (%p122_p0, %s210_s1), 0  ;;  %s56_s28 = sld [smem:[#allocation3]] (!%p124_p1) }
   0x4   :  { %s217_s1 = smov (!%p124_p1, %s215_s1), 0  ;;  %52 = sbr.rel (%p124_p1) target bundleno = 51 (0x33), region = 17 }
   0x5   :  { %s126_s0 = sshll.u32 %s217_s1, 3 }
   0x6   :  { %s38_s27 = scalar_lea.vmem %s213_s2, %s126_s0 }
   0x7   :  { %v53_v1 = vld [vmem:[%s38_s27] sm:$0xff] (!%p124_p1) }
   0x9   :  { %p130_p2 = scmp.lt.s32.totalorder (!%p124_p1), %s56_s28, 8 }
   0xb   :  { %60 = sbr.rel (%p130_p2) target bundleno = 28 (0x1c), region = 21  ;;  %vm62_vm1 = vcmask (!%p130_p2), 523264   ;;  %v61_v8 = vld [vmem:[%s212_s4] sm:$0x1] (!%p130_p2) }
   0xc   :  { %v63_v2 = vsel (!%p130_p2), %vm62_vm1, %v53_v1, 0.0 }
   0xd   :  { %v64_v3 = vrot.slane (!%p130_p2), %v63_v2, 4 }
   0xf   :  { %v65_v4 = vadd.f32 (!%p130_p2), %v64_v3, %v63_v2 }
  0x11   :  { %v66_v5 = vrot.slane (!%p130_p2), %v65_v4, 2 }
  0x13   :  { %v67_v6 = vadd.f32 %v66_v5, %v65_v4 }
  0x15   :  { %v68_v7 = vrot.slane %v67_v6, 1 }
  0x17   :  { %v69_v9 = vadd.f32 %v68_v7, %v67_v6 }
  0x19   :  { %v70_v10 = vadd.f32 %v69_v9, %v61_v8 }
  0x1b   :  { %72 = vst.msk [vmem:[%s212_s4] sm:$0x1] %vm46_vm0, %v70_v10 }
  0x1c PF:  { %p132_p3 = scmp.ge.s32.totalorder %s56_s28, 8 }
  0x1d   :  { %v78_v11 = vlaneseq (!%p132_p3)  ;;  %v133_v12 = vld [vmem:[%s211_s3] ss:$0 sm:$0xff] (!%p132_p3)  ;;  %vm90_vm2 = vcmask (!%p132_p3), 523264  }
  0x1e   :  { %76 = sbr.rel (%p132_p3) target bundleno = 51 (0x33), region = 25 }
  0x1f   :  { %v79_v13 = vshrl.u32 (!%p132_p3), %v78_v11, 7 }
  0x21   :  { %vm87_vm3 = vcmp.lt.s32.totalorder (!%p132_p3), %v79_v13, %v133_v12 }
  0x22   :  { %v88_v14 = vsel (!%p132_p3), %vm87_vm3, %v53_v1, 0.0  ;;  %v89_v21 = vld [vmem:[%s212_s4] sm:$0x1] (!%p132_p3) }
  0x23   :  { %v91_v15 = vsel (!%p132_p3), %vm90_vm2, %v88_v14, 0.0 }
  0x24   :  { %v92_v16 = vrot.slane (!%p132_p3), %v91_v15, 4 }
  0x26   :  { %v93_v17 = vadd.f32 %v92_v16, %v91_v15 }
  0x28   :  { %v94_v18 = vrot.slane %v93_v17, 2 }
  0x2a   :  { %v95_v19 = vadd.f32 %v94_v18, %v93_v17 }
  0x2c   :  { %v96_v20 = vrot.slane %v95_v19, 1 }
  0x2e   :  { %v97_v22 = vadd.f32 %v96_v20, %v95_v19 }
  0x30   :  { %v98_v23 = vadd.f32 %v97_v22, %v89_v21 }
  0x32   :  { %100 = vst.msk [vmem:[%s212_s4] sm:$0x1] %vm46_vm0, %v98_v23 }
  0x33 PF:  { %v104_v24 = vld [vmem:[%s211_s3] sm:$0x1] }
  0x34   :  { %v105_v25 = vcvt.s32.f32 %v104_v24 }
  0x36   :  { %v106_v26 = vmax.f32 %v105_v25, 1.0 }
  0x38   :  { %135 = vrcp.f32 %v106_v26 }
  0x39   :  { %v107_v27 = vld [vmem:[%s212_s4] sm:$0x1] }
  0x42   :  { %v136_v28 = vpop.eup %135 }
  0x43   :  { %v109_v29 = vmul.f32 %v136_v28, %v107_v27 }
  0x45   :  { %111 = vst.msk [vmem:[%s212_s4] sm:$0x1] %vm46_vm0, %v109_v29 }

// kernel: model_forward.3
= control target key start
LH: loop header
LB: loop body
LE: loop exit
PB: predicated region body
PF: predicated region fallthrough
CT: control target
= control target key end

     0   :  { %v169_v3 = vmov 0.0|0.0   ;;  %vm170_vm0 = vmmov 0   ;;  %v171_v6 = vmov 0.0   ;;  %s223_s0 = inlined_call_operand.vmem [shape: f32[2,32], index: 0, kind: input, shape index: {}]   ;;  %s224_s1 = inlined_call_operand.vmem [shape: f32[32,16], index: 1, kind: input, shape index: {}]   ;;  %s225_s2 = inlined_call_operand.vmem [shape: f32[1,16], index: 2, kind: input, shape index: {}]   ;;  %s226_s3 = inlined_call_operand.hbm [shape: f32[2,16], index: 3, kind: output, shape index: {}]  }
   0x1   :  { %v16_v0 = vld [vmem:[%s224_s1] sm:$0xff]  ;;  %v17_v1 = vld [vmem:[%s224_s1 + $0x8] sm:$0xff]  ;;  %v18_v2 = vld [vmem:[%s224_s1 + $0x10] sm:$0xff]  ;;  %135 = vmatprep.subr.bf16.mxu0 %v169_v3  ;;  %132 = vmatprep.mubr.msk.f32.mxu0 %vm170_vm0, %v171_v6 }
   0x2   :  { %v136_v4 = vpack.c.bf16 %v17_v1, %v16_v0  ;;  %v19_v5 = vld [vmem:[%s224_s1 + $0x18] sm:$0xff] }
   0x3   :  { %8 = vsyncpa [#allocation3], 0  ;;  %v139_v7 = vpack.c.bf16 %v19_v5, %v18_v2  ;;  %v15_v8 = vld [vmem:[%s223_s0] sm:$0x3]  ;;  %vm27_vm1 = vcmask 261120   ;;  %s172_s24 = smov [#allocation2]  }
   0x4   :  { %137 = vmatpush3.bf16.msra.mxu0 %v136_v4  ;;  %v117_v9 = vld [vmem:[%s225_s2] ss:$0 sm:$0xff]  ;;  %s109_s1 = sshll.u32 %s172_s24, 4  ;;  %vm101_vm2 = vcmask 123904   ;;  %s110_s1 = int_to_ptr.vmem [resolvable:$true] %s109_s1 }
   0x5   :  { %138 = vmatprep.subr.bf16.mxu0 %v169_v3  ;;  %s145_s25 = scalar_lea.vmem %s110_s1, 32  ;;  %p150_p1 = scmp.lt.s32.totalorder %s110_s1, %s110_s1 }
   0x6   :  { %p146_p0 = scmp.ne.s32.totalorder %s110_s1, %s145_s25  ;;  %p151_p2 = scmp.lt.s32.totalorder %s145_s25, %s145_s25 }
   0x8   :  { %140 = vmatpush3.bf16.msra.mxu0 %v139_v7  ;;  %p152_p3 = por %p151_p2, %p150_p1 }
   0xa   :  { %p153_p4 = pnand %p152_p3, %p146_p0 }
   0xb   :  { %133 = vmatmul.mubr.msk.f32.vlgmr.msra.gmra.mrb[0].mxu0 %vm27_vm1, %v15_v8 }
  0xde   :  { %v97_v10 = vpop.f32.mrb[0].mxu0 }
  0xdf   :  { %v98_v11 = vadd.f32 %v117_v9, %v97_v10  ;;  %v134_v12 = vpop.f32.mrb[1].mxu0 }
  0xe1   :  { %102 = vst.msk [vmem:[#allocation2] sm:$0x3] %vm101_vm2, %v98_v11 }
  0xe2   :  { %156 = shalt.err (!%p153_p4)
}
  0xe3   :  { %s157_s27 = scalar_lea.hbm %s226_s3, 32 }
  0xe4   :  { %p158_p5 = scmp.ne.s32.totalorder %s226_s3, %s157_s27  ;;  %p161_p6 = scmp.lt.u32.totalorder %s157_s27, %s226_s3 }
  0xe6   :  { %p163_p7 = pnand %p161_p6, %p158_p5 }
  0xe8   :  { %166 = shalt.err (!%p163_p7)
}
  0xe9   :  { %112 = dma.vmem_to_hbm [thread:$0]  %s110_s1, 32, %s226_s3, [#allocation3]  }
  0xea   :  { %167 = dma.done.wait [#allocation3], 32  }
  0xeb   :  { %168 = vsyncadd [#allocation3], 4294967264 }
  0xec   :  { %116 = vsyncpa [#allocation3], 1 }

</bundles_post_ra>
